<compile_context>
chip_gen: v7x
topology: tpu7x:2x2x1
jax: 0.10.0
libtpu: 0.0.40
codegen_flags: <defaults>
</compile_context>

<pallas_src>
import jax
import jax.numpy as jnp
import numpy as np
from jax.experimental import pallas as pl
from jax.experimental.pallas import tpu as pltpu  # noqa: F401  (TPU backend import)


def _copy_kernel(k_ref, q_ref, k_out_ref, q_out_ref):
    # Entire forward semantics of InductiveParameter: return the parameters.
    k_out_ref[...] = k_ref[...]
    q_out_ref[...] = q_ref[...]


def _lane_dense_2d(shape):
    """Pick a full-array 2D presentation with the widest possible last axis.

    Because the block IS the full array, the (8,128) divisibility rule does not
    apply, so any factorization is legal; we only care about lane-dense stores.
    """
    P, P2, R, F = shape
    n = P * P2 * R * F
    if n % 128 == 0:
        return (n // 128, 128)           # unmasked full-width vst path
    # Fallback: widest last axis available without padding (still a legal
    # full-array block); avoids the narrow (.., F) masked-store shape.
    return (P * P2, R * F)


def inductive_parameter_forward(K: jax.Array, Q: jax.Array):
    """Reproduces InductiveParameter.forward: returns (K, Q)."""
    assert K.shape == Q.shape and K.dtype == Q.dtype
    flat_shape = _lane_dense_2d(K.shape)

    # In JAX the reshape is a logical/metadata op; under jit any (tiny) relayout it
    # implies is fused by XLA.  For very large parameters with a non-lane-dense
    # trailing dim one would instead pass the original 4D shape with a full-array
    # BlockSpec to avoid a wrapper-side relayout dominating the kernel.
    k2 = K.reshape(flat_shape)
    q2 = Q.reshape(flat_shape)

    # One whole-array block per tensor, single grid step: no per-step pipeline
    # overhead, no masked partial stores.
    spec = pl.BlockSpec(flat_shape, lambda i: (0, 0))

    nbytes = K.size * K.dtype.itemsize + Q.size * Q.dtype.itemsize

    k_out, q_out = pl.pallas_call(
        _copy_kernel,
        grid=(1,),
        in_specs=[spec, spec],
        out_specs=(spec, spec),
        out_shape=(
            jax.ShapeDtypeStruct(flat_shape, K.dtype),
            jax.ShapeDtypeStruct(flat_shape, Q.dtype),
        ),
        # Outputs alias the inputs: no fresh output allocation, writeback targets
        # the same pages (cuts HBM traffic for this identity op roughly in half).
        input_output_aliases={0: 0, 1: 1},
        # Zero-compute hint so XLA does not schedule this as heavy work.
        cost_estimate=pl.CostEstimate(
            flops=0, transcendentals=0, bytes_accessed=2 * nbytes
        ),
    )(k2, q2)

    return k_out.reshape(K.shape), q_out.reshape(Q.shape)


if __name__ == "__main__":
    # Module hyperparameters (small, consistent with __init__).
    num_particles = 4
    num_rbf = 8
    out_features = 32

    # Deterministic parameter init (stand-in for torch.randn in __init__).
    key = jax.random.PRNGKey(0)
    k_key, q_key = jax.random.split(key)
    shape = (num_particles, num_particles, num_rbf, out_features)
    K = jax.random.normal(k_key, shape, dtype=jnp.float32)
    Q = jax.random.normal(q_key, shape, dtype=jnp.float32)

    # Host-side references for verification.
    K_np = np.asarray(K)
    Q_np = np.asarray(Q)

    fwd = jax.jit(inductive_parameter_forward)
    K_out, Q_out = fwd(K, Q)
    jax.block_until_ready((K_out, Q_out))

    # Verify forward semantics: outputs are exactly the parameters.
    assert K_out.shape == shape and Q_out.shape == shape
    assert np.array_equal(np.asarray(K_out), K_np)
    assert np.array_equal(np.asarray(Q_out), Q_np)

    print("KERNEL_OK")
</pallas_src>

<mosaic_0001>
module attributes {stable_mosaic.version = 11 : i64} {
  func.func @_copy_kernel(%arg0: i32, %arg1: memref<32x128xf32, #tpu.memory_space<vmem>>, %arg2: memref<32x128xf32, #tpu.memory_space<vmem>>, %arg3: memref<32x128xf32, #tpu.memory_space<vmem>>, %arg4: memref<32x128xf32, #tpu.memory_space<vmem>>) attributes {dimension_semantics = [#tpu.dimension_semantics<arbitrary>], iteration_bounds = array<i64: 1>, scalar_prefetch = 0 : i64, scratch_operands = 0 : i64, tpu.core_type = #tpu.core_type<tc>, window_params = [{pipeline_mode = #tpu.pipeline_mode<synchronous>, transform_indices = @transform_0, window_bounds = array<i64: 32, 128>}, {pipeline_mode = #tpu.pipeline_mode<synchronous>, transform_indices = @transform_1, window_bounds = array<i64: 32, 128>}, {pipeline_mode = #tpu.pipeline_mode<synchronous>, transform_indices = @transform_2, window_bounds = array<i64: 32, 128>}, {pipeline_mode = #tpu.pipeline_mode<synchronous>, transform_indices = @transform_3, window_bounds = array<i64: 32, 128>}]} {
    %c0 = arith.constant 0 : index
    %c0_0 = arith.constant 0 : index
    %0 = vector.load %arg1[%c0, %c0_0] : memref<32x128xf32, #tpu.memory_space<vmem>>, vector<32x128xf32>
    %c0_1 = arith.constant 0 : index
    %c0_2 = arith.constant 0 : index
    %1 = vector.load %arg3[%c0_1, %c0_2] : memref<32x128xf32, #tpu.memory_space<vmem>>, vector<32x128xf32>
    tpu.vector_store %arg3[%c0_1, %c0_2], %0 {strides = array<i32>} : memref<32x128xf32, #tpu.memory_space<vmem>>, vector<32x128xf32>,
    %c0_3 = arith.constant 0 : index
    %c0_4 = arith.constant 0 : index
    %2 = vector.load %arg2[%c0_3, %c0_4] : memref<32x128xf32, #tpu.memory_space<vmem>>, vector<32x128xf32>
    %c0_5 = arith.constant 0 : index
    %c0_6 = arith.constant 0 : index
    %3 = vector.load %arg4[%c0_5, %c0_6] : memref<32x128xf32, #tpu.memory_space<vmem>>, vector<32x128xf32>
    tpu.vector_store %arg4[%c0_5, %c0_6], %2 {strides = array<i32>} : memref<32x128xf32, #tpu.memory_space<vmem>>, vector<32x128xf32>,
    return
  }
  func.func @transform_0(%arg0: i32) -> (i32, i32) {
    %c0_i32 = arith.constant 0 : i32
    %c0_i32_0 = arith.constant 0 : i32
    %c0_i32_1 = arith.constant 0 : i32
    return %c0_i32, %c0_i32_0 : i32, i32
  }
  func.func @transform_1(%arg0: i32) -> (i32, i32) {
    %c0_i32 = arith.constant 0 : i32
    %c0_i32_0 = arith.constant 0 : i32
    %c0_i32_1 = arith.constant 0 : i32
    return %c0_i32, %c0_i32_0 : i32, i32
  }
  func.func @transform_2(%arg0: i32) -> (i32, i32) {
    %c0_i32 = arith.constant 0 : i32
    %c0_i32_0 = arith.constant 0 : i32
    %c0_i32_1 = arith.constant 0 : i32
    return %c0_i32, %c0_i32_0 : i32, i32
  }
  func.func @transform_3(%arg0: i32) -> (i32, i32) {
    %c0_i32 = arith.constant 0 : i32
    %c0_i32_0 = arith.constant 0 : i32
    %c0_i32_1 = arith.constant 0 : i32
    return %c0_i32, %c0_i32_0 : i32, i32
  }
}

</mosaic_0001>

<bundles_post_ra>
// kernel: inductive_parameter_forward.1
= control target key start
LH: loop header
LB: loop body
LE: loop exit
PB: predicated region body
PF: predicated region fallthrough
CT: control target
= control target key end

     0   :  { %s105_s0 = inlined_call_operand.vmem [shape: f32[32,128], index: 0, kind: input, shape index: {}, may-alias: {0,2}]   ;;  %s106_s2 = inlined_call_operand.vmem [shape: f32[32,128], index: 2, kind: output, shape index: {0}, may-alias: {0,2}]   ;;  %s107_s1 = inlined_call_operand.vmem [shape: f32[32,128], index: 1, kind: input, shape index: {}, may-alias: {1,3}]   ;;  %s108_s3 = inlined_call_operand.vmem [shape: f32[32,128], index: 3, kind: output, shape index: {1}, may-alias: {1,3}]  }
   0x1   :  { %v13_v0 = vld [vmem:[%s105_s0] sm:$0xff]  ;;  %v14_v1 = vld [vmem:[%s105_s0 + $0x8] sm:$0xff]  ;;  %v15_v2 = vld [vmem:[%s105_s0 + $0x10] sm:$0xff] }
   0x2   :  { %17 = vst [vmem:[%s106_s2] sm:$0xff] %v13_v0  ;;  %18 = vst [vmem:[%s106_s2 + $0x8] sm:$0xff] %v14_v1  ;;  %v21_v4 = vld [vmem:[%s107_s1] sm:$0xff]  ;;  %v22_v5 = vld [vmem:[%s107_s1 + $0x8] sm:$0xff] }
   0x3   :  { %19 = vst [vmem:[%s106_s2 + $0x10] sm:$0xff] %v15_v2  ;;  %25 = vst [vmem:[%s108_s3] sm:$0xff] %v21_v4 }
   0x4   :  { %26 = vst [vmem:[%s108_s3 + $0x8] sm:$0xff] %v22_v5 }
   0xa   :  { %v16_v3 = vld [vmem:[%s105_s0 + $0x18] sm:$0xff] }
   0xb   :  { %20 = vst [vmem:[%s106_s2 + $0x18] sm:$0xff] %v16_v3  ;;  %v23_v6 = vld [vmem:[%s107_s1 + $0x10] sm:$0xff]  ;;  %v24_v7 = vld [vmem:[%s107_s1 + $0x18] sm:$0xff] }
   0xc   :  { %27 = vst [vmem:[%s108_s3 + $0x10] sm:$0xff] %v23_v6  ;;  %28 = vst [vmem:[%s108_s3 + $0x18] sm:$0xff] %v24_v7 }

</bundles_post_ra>
